<compile_context>
chip_gen: v7x
topology: tpu7x:2x2x1
jax: 0.10.0
libtpu: 0.0.40
codegen_flags: <defaults>
</compile_context>

<pallas_src>
import functools

import jax
import jax.numpy as jnp
from jax import lax
from jax.experimental import pallas as pl
from jax.experimental.pallas import tpu as pltpu


# ------------------------------ helpers ------------------------------------ #

def _cdiv(a, b):
    return -(-a // b)


# Cap on batch elements per grid step (bounds the static unroll / MXU ops per step).
_MAX_BATCH_BLOCK = 16


def _vmem_limit_bytes():
    """Scoped-VMEM limit per chip generation (96 MiB on 128-MiB chips, 48 MiB otherwise)."""
    cap = 0
    try:
        info = pltpu.get_tpu_info()
        for name in ("vmem_capacity_bytes", "vmem_size_bytes", "vmem_bytes"):
            v = getattr(info, name, None)
            if v:
                cap = int(v)
                break
    except Exception:
        cap = 0
    if cap >= (96 << 20):      # v5e / v6e: 128 MiB physical VMEM
        return 96 << 20
    return 48 << 20            # v7x (64 MiB physical) or unknown -> conservative


# ------------------------------ kernels ------------------------------------ #
# Block layouts: x (nb, Cin, tile), w (Cout, Cin), b (Cout, 1) f32.
# HW (lanes) is always the last dim of x and of dense outputs.

def _o2o_nopool_kernel(x_ref, w_ref, b_ref, o_ref, *, apply_relu, nb):
    w = w_ref[...]
    b = b_ref[...]
    for i in range(nb):                       # static unroll over batch block
        y = jnp.dot(w, x_ref[i], preferred_element_type=jnp.float32) + b
        if apply_relu:
            y = jnp.maximum(y, 0.0)
        o_ref[i] = y.astype(o_ref.dtype)      # lane-dense store (Cout, tile)


def _o2o_pool_relu_single_kernel(x_ref, w_ref, b_ref, o_ref, *, nb, inv_hw):
    # Whole HW row in one tile: conv + relu + mean per batch element.
    w = w_ref[...]
    b = b_ref[...]
    for i in range(nb):
        y = jnp.dot(w, x_ref[i], preferred_element_type=jnp.float32) + b
        y = jnp.maximum(y, 0.0)
        o_ref[i] = (jnp.sum(y, axis=-1, keepdims=True) * inv_hw).astype(o_ref.dtype)


def _o2o_pool_relu_tiled_kernel(x_ref, w_ref, b_ref, o_ref, acc_ref, *,
                                hw, tile, needs_mask, inv_hw):
    # grid = (N, num_tiles); HW-tile axis is the innermost ("arbitrary") axis.
    # acc_ref: (Cout, tile) f32, lane-wide accumulation (VPU), one cross-lane
    # reduction at finalize only.
    p = pl.program_id(1)

    @pl.when(p == 0)
    def _():
        acc_ref[...] = jnp.zeros_like(acc_ref)

    y = jnp.dot(w_ref[...], x_ref[0], preferred_element_type=jnp.float32) + b_ref[...]
    y = jnp.maximum(y, 0.0)
    if needs_mask:
        # Padded / out-of-bounds spatial positions carry garbage -> zero them.
        col = p * tile + lax.broadcasted_iota(jnp.int32, y.shape, 1)
        y = jnp.where(col < hw, y, 0.0)
    acc_ref[...] += y

    @pl.when(p == pl.num_programs(1) - 1)
    def _():
        o_ref[0] = (jnp.sum(acc_ref[...], axis=-1, keepdims=True) * inv_hw
                    ).astype(o_ref.dtype)


def _mean_pool_single_kernel(x_ref, o_ref, *, nb, inv_hw):
    # Pool-first shortcut (apply_relu=False): just mean(x) over HW, in f32.
    for i in range(nb):
        o_ref[i] = jnp.sum(x_ref[i].astype(jnp.float32), axis=-1,
                           keepdims=True) * inv_hw


def _mean_pool_tiled_kernel(x_ref, o_ref, acc_ref, *, hw, tile, needs_mask, inv_hw):
    p = pl.program_id(1)

    @pl.when(p == 0)
    def _():
        acc_ref[...] = jnp.zeros_like(acc_ref)

    xs = x_ref[0].astype(jnp.float32)
    if needs_mask:
        col = p * tile + lax.broadcasted_iota(jnp.int32, xs.shape, 1)
        xs = jnp.where(col < hw, xs, 0.0)
    acc_ref[...] += xs                        # (Cin, tile) lane-wide accumulation

    @pl.when(p == pl.num_programs(1) - 1)
    def _():
        o_ref[0] = jnp.sum(acc_ref[...], axis=-1, keepdims=True) * inv_hw


# ------------------------------ wrapper ------------------------------------ #

def o2o_block(x_nchw, weight, bias, *, global_pool, apply_relu):
    """Forward pass of O2OBlock.

    Args:
      x_nchw: (N, Cin, H, W) input (PyTorch NCHW convention).
      weight: (Cout, Cin) 1x1-conv weight (conv.weight[:, :, 0, 0]).
      bias:   (Cout,) bias.
      global_pool: if True, returns (N, Cout) mean over H,W; else (N, Cout, H, W).
      apply_relu: whether the optional activation layer is nn.ReLU.
    """
    N, Cin, H, W = x_nchw.shape
    Cout, wcin = weight.shape
    assert wcin == Cin, (weight.shape, Cin)
    HW = H * W
    dtype = x_nchw.dtype
    itemsize = jnp.dtype(dtype).itemsize
    inv_hw = 1.0 / HW

    # Stay in NCHW; only flatten spatial dims (free reshape, no transpose, no pad).
    x = x_nchw.reshape(N, Cin, HW)
    w = weight
    b_f32 = bias.astype(jnp.float32).reshape(Cout, 1)

    pool_no_relu = global_pool and not apply_relu

    # ----- VMEM-budget-driven tiling ---------------------------------------
    vmem_limit = _vmem_limit_bytes()
    # TODO(synk): weight/bias blocks could be single-buffered (pl.Buffered(1))
    # to reclaim ~2 MiB at 512x512; accounted for in the budget instead.
    fixed = 2 * (Cout * Cin * jnp.dtype(w.dtype).itemsize + Cout * 4)
    budget = max(int(vmem_limit * 0.8) - fixed, 1 << 20)

    if pool_no_relu:
        per_lane = 2 * Cin * itemsize + 4 * Cin            # x dbl-buf + f32 acc
    elif global_pool:
        per_lane = 2 * Cin * itemsize + 4 * Cout           # x dbl-buf + f32 acc
    else:
        per_lane = 2 * (Cin + Cout) * itemsize             # x + out dbl-buf
    lane_budget = max(budget // per_lane, 128)

    if HW <= lane_budget:
        # Whole HW row fits in one tile: block several batch rows per step.
        tile, num_tiles, needs_mask = HW, 1, False
        per_batch = per_lane * HW
        nb = int(max(1, min(N, _MAX_BATCH_BLOCK, budget // max(per_batch, 1))))
    else:
        tile = (lane_budget // 128) * 128                  # lane-aligned HW tile
        num_tiles = _cdiv(HW, tile)
        needs_mask = (HW % tile) != 0                      # ragged last tile
        nb = 1
    nb_blocks = _cdiv(N, nb)
    grid = (nb_blocks, num_tiles)

    x_spec = pl.BlockSpec((nb, Cin, tile), lambda n, p: (n, 0, p))
    w_spec = pl.BlockSpec((Cout, Cin), lambda n, p: (0, 0))
    b_spec = pl.BlockSpec((Cout, 1), lambda n, p: (0, 0))

    flops = (2 * N * Cin * HW) if pool_no_relu else (2 * N * HW * Cin * Cout)
    out_elems = N * Cout * (1 if global_pool else HW)
    cost = pl.CostEstimate(
        flops=flops, transcendentals=0,
        bytes_accessed=(N * Cin * HW + Cout * Cin + Cout + out_elems) * itemsize)

    pool_semantics = ("parallel", "arbitrary" if num_tiles > 1 else "parallel")

    if pool_no_relu:
        # mean_hw(W @ x + b) == W @ mean_hw(x) + b: kernel only stream-reduces x
        # (pure HBM read); the tiny (N,Cin)->(N,Cout) affine is an XLA epilogue.
        if num_tiles == 1:
            kernel = functools.partial(_mean_pool_single_kernel, nb=nb, inv_hw=inv_hw)
            scratch = []
        else:
            kernel = functools.partial(_mean_pool_tiled_kernel, hw=HW, tile=tile,
                                       needs_mask=needs_mask, inv_hw=inv_hw)
            scratch = [pltpu.VMEM((Cin, tile), jnp.float32)]
        xmean = pl.pallas_call(
            kernel,
            out_shape=jax.ShapeDtypeStruct((N, Cin, 1), jnp.float32),
            grid_spec=pltpu.PrefetchScalarGridSpec(
                num_scalar_prefetch=0,
                grid=grid,
                in_specs=[x_spec],
                out_specs=pl.BlockSpec((nb, Cin, 1), lambda n, p: (n, 0, 0)),
                scratch_shapes=scratch,
            ),
            compiler_params=pltpu.CompilerParams(
                dimension_semantics=pool_semantics,
                vmem_limit_bytes=vmem_limit),
            cost_estimate=cost,
        )(x)
        y = (jnp.einsum('nc,oc->no', xmean[:, :, 0], w.astype(jnp.float32))
             + bias.astype(jnp.float32)[None, :])
        return y.astype(dtype)                              # (N, Cout)

    if global_pool:
        # Pooled + ReLU: per-pixel conv+relu is required before the mean.
        # TODO(synk): on v7x with N == 1 the HW reduction could be split into a
        # leading size-2 parallel axis (per-TC partial sums) to use both cores.
        if num_tiles == 1:
            kernel = functools.partial(_o2o_pool_relu_single_kernel,
                                       nb=nb, inv_hw=inv_hw)
            scratch = []
        else:
            kernel = functools.partial(_o2o_pool_relu_tiled_kernel, hw=HW, tile=tile,
                                       needs_mask=needs_mask, inv_hw=inv_hw)
            scratch = [pltpu.VMEM((Cout, tile), jnp.float32)]
        out = pl.pallas_call(
            kernel,
            out_shape=jax.ShapeDtypeStruct((N, Cout, 1), dtype),
            grid_spec=pltpu.PrefetchScalarGridSpec(
                num_scalar_prefetch=0,
                grid=grid,
                in_specs=[x_spec, w_spec, b_spec],
                out_specs=pl.BlockSpec((nb, Cout, 1), lambda n, p: (n, 0, 0)),
                scratch_shapes=scratch,
            ),
            compiler_params=pltpu.CompilerParams(
                dimension_semantics=pool_semantics,
                vmem_limit_bytes=vmem_limit),
            cost_estimate=cost,
        )(x, w, b_f32)
        return out[:, :, 0]                                 # (N, Cout)

    # No pooling: dense (N, Cout, H, W) output, fully parallel grid.
    kernel = functools.partial(_o2o_nopool_kernel, apply_relu=apply_relu, nb=nb)
    out = pl.pallas_call(
        kernel,
        out_shape=jax.ShapeDtypeStruct((N, Cout, HW), dtype),
        grid_spec=pltpu.PrefetchScalarGridSpec(
            num_scalar_prefetch=0,
            grid=grid,
            in_specs=[x_spec, w_spec, b_spec],
            out_specs=pl.BlockSpec((nb, Cout, tile), lambda n, p: (n, 0, p)),
        ),
        compiler_params=pltpu.CompilerParams(
            dimension_semantics=("parallel", "parallel"),
            vmem_limit_bytes=vmem_limit),
        cost_estimate=cost,
    )(x, w, b_f32)
    return out.reshape(N, Cout, H, W)


# ------------------------------ reference ----------------------------------- #

def o2o_block_ref(x_nchw, weight, bias, *, global_pool, apply_relu):
    # Pure-JAX reference matching PyTorch semantics.
    y = jnp.einsum('nchw,oc->nohw', x_nchw, weight) + bias[None, :, None, None]
    if apply_relu:
        y = jnp.maximum(y, 0.0)
    if global_pool:
        return jnp.mean(y, axis=(2, 3))            # (N, Cout)
    return y                                        # (N, Cout, H, W)


# --------------------------------- main ------------------------------------- #

if __name__ == "__main__":
    key = jax.random.PRNGKey(0)
    k_x, k_w, k_b, k_x2 = jax.random.split(key, 4)

    # O2OBlock(in_channel=4, out_channel=8, global_pool=True, acti_layer=nn.ReLU)
    N, Cin, H, W = 2, 4, 16, 16
    Cout = 8

    x = jax.random.normal(k_x, (N, Cin, H, W), dtype=jnp.float32)
    weight = jax.random.normal(k_w, (Cout, Cin), dtype=jnp.float32) * 0.1
    bias = jax.random.normal(k_b, (Cout,), dtype=jnp.float32) * 0.1

    # 1) pooled + ReLU (the configured module).
    out = jax.block_until_ready(
        o2o_block(x, weight, bias, global_pool=True, apply_relu=True))
    ref = o2o_block_ref(x, weight, bias, global_pool=True, apply_relu=True)
    assert out.shape == ref.shape, (out.shape, ref.shape)
    assert jnp.allclose(out, ref, atol=1e-5, rtol=1e-5), \
        float(jnp.max(jnp.abs(out - ref)))

    # 2) no-pool + ReLU path.
    out2 = jax.block_until_ready(
        o2o_block(x, weight, bias, global_pool=False, apply_relu=True))
    ref2 = o2o_block_ref(x, weight, bias, global_pool=False, apply_relu=True)
    assert out2.shape == ref2.shape, (out2.shape, ref2.shape)
    assert jnp.allclose(out2, ref2, atol=1e-5, rtol=1e-5), \
        float(jnp.max(jnp.abs(out2 - ref2)))

    # 3) pooled, no activation, HW not a multiple of 128 (pool-first shortcut,
    #    full-extent ragged tile, no pad / slice).
    x3 = jax.random.normal(k_x2, (N, Cin, 10, 10), dtype=jnp.float32)
    out3 = jax.block_until_ready(
        o2o_block(x3, weight, bias, global_pool=True, apply_relu=False))
    ref3 = o2o_block_ref(x3, weight, bias, global_pool=True, apply_relu=False)
    assert out3.shape == ref3.shape, (out3.shape, ref3.shape)
    assert jnp.allclose(out3, ref3, atol=1e-5, rtol=1e-5), \
        float(jnp.max(jnp.abs(out3 - ref3)))

    print("KERNEL_OK")
</pallas_src>

<mosaic_0001>
module attributes {stable_mosaic.version = 11 : i64} {
  func.func @_o2o_pool_relu_single_kernel(%arg0: i32, %arg1: i32, %arg2: memref<2x4x256xf32, #tpu.memory_space<vmem>>, %arg3: memref<8x4xf32, #tpu.memory_space<vmem>>, %arg4: memref<8x1xf32, #tpu.memory_space<vmem>>, %arg5: memref<2x8x1xf32, #tpu.memory_space<vmem>>) attributes {dimension_semantics = [#tpu.dimension_semantics<parallel>, #tpu.dimension_semantics<parallel>], iteration_bounds = array<i64: 1, 1>, scalar_prefetch = 0 : i64, scratch_operands = 0 : i64, tpu.core_type = #tpu.core_type<tc>, window_params = [{transform_indices = @transform_0, window_bounds = array<i64: 2, 4, 256>}, {pipeline_mode = #tpu.pipeline_mode<synchronous>, transform_indices = @transform_1, window_bounds = array<i64: 8, 4>}, {pipeline_mode = #tpu.pipeline_mode<synchronous>, transform_indices = @transform_2, window_bounds = array<i64: 8, 1>}, {transform_indices = @transform_3, window_bounds = array<i64: 2, 8, 1>}]} {
    %c0 = arith.constant 0 : index
    %c0_0 = arith.constant 0 : index
    %0 = vector.load %arg3[%c0, %c0_0] : memref<8x4xf32, #tpu.memory_space<vmem>>, vector<8x4xf32>
    %c0_1 = arith.constant 0 : index
    %c0_2 = arith.constant 0 : index
    %1 = vector.load %arg4[%c0_1, %c0_2] : memref<8x1xf32, #tpu.memory_space<vmem>>, vector<8x1xf32>
    %c0_3 = arith.constant 0 : index
    %c0_4 = arith.constant 0 : index
    %c0_5 = arith.constant 0 : index
    %2 = vector.load %arg2[%c0_3, %c0_4, %c0_5] : memref<2x4x256xf32, #tpu.memory_space<vmem>>, vector<1x4x256xf32>
    %3 = vector.shape_cast %2 : vector<1x4x256xf32> to vector<4x256xf32>
    %cst = arith.constant dense<0.000000e+00> : vector<8x256xf32>
    %4 = tpu.matmul %0, %3, %cst {dimension_numbers = #tpu.dot_dimension_numbers<[1], [0], [0], [1], [0, 0, 1, 1], [], []>} : vector<8x4xf32>, vector<4x256xf32>, vector<8x256xf32> -> vector<8x256xf32>
    %5 = vector.broadcast %1 : vector<8x1xf32> to vector<8x256xf32>
    %6 = arith.addf %4, %5 : vector<8x256xf32>
    %cst_6 = arith.constant 0.000000e+00 : f32
    %7 = vector.broadcast %cst_6 : f32 to vector<8x256xf32>
    %8 = arith.maximumf %6, %7 : vector<8x256xf32>
    %cst_7 = arith.constant dense<0.000000e+00> : vector<8xf32>
    %9 = vector.multi_reduction <add>, %8, %cst_7 [1] : vector<8x256xf32> to vector<8xf32>
    %10 = vector.shape_cast %9 : vector<8xf32> to vector<8x1xf32>
    %cst_8 = arith.constant 3.906250e-03 : f32
    %11 = vector.broadcast %cst_8 : f32 to vector<8x1xf32>
    %12 = arith.mulf %10, %11 : vector<8x1xf32>
    %c0_9 = arith.constant 0 : index
    %c0_10 = arith.constant 0 : index
    %c0_11 = arith.constant 0 : index
    %13 = vector.load %arg5[%c0_9, %c0_10, %c0_11] : memref<2x8x1xf32, #tpu.memory_space<vmem>>, vector<1x8x1xf32>
    %14 = vector.shape_cast %13 : vector<1x8x1xf32> to vector<8x1xf32>
    %15 = vector.shape_cast %12 : vector<8x1xf32> to vector<1x8x1xf32>
    tpu.vector_store %arg5[%c0_9, %c0_10, %c0_11], %15 {strides = array<i32>} : memref<2x8x1xf32, #tpu.memory_space<vmem>>, vector<1x8x1xf32>,
    %c1 = arith.constant 1 : index
    %c0_12 = arith.constant 0 : index
    %c0_13 = arith.constant 0 : index
    %16 = vector.load %arg2[%c1, %c0_12, %c0_13] : memref<2x4x256xf32, #tpu.memory_space<vmem>>, vector<1x4x256xf32>
    %17 = vector.shape_cast %16 : vector<1x4x256xf32> to vector<4x256xf32>
    %cst_14 = arith.constant dense<0.000000e+00> : vector<8x256xf32>
    %18 = tpu.matmul %0, %17, %cst_14 {dimension_numbers = #tpu.dot_dimension_numbers<[1], [0], [0], [1], [0, 0, 1, 1], [], []>} : vector<8x4xf32>, vector<4x256xf32>, vector<8x256xf32> -> vector<8x256xf32>
    %19 = vector.broadcast %1 : vector<8x1xf32> to vector<8x256xf32>
    %20 = arith.addf %18, %19 : vector<8x256xf32>
    %cst_15 = arith.constant 0.000000e+00 : f32
    %21 = vector.broadcast %cst_15 : f32 to vector<8x256xf32>
    %22 = arith.maximumf %20, %21 : vector<8x256xf32>
    %cst_16 = arith.constant dense<0.000000e+00> : vector<8xf32>
    %23 = vector.multi_reduction <add>, %22, %cst_16 [1] : vector<8x256xf32> to vector<8xf32>
    %24 = vector.shape_cast %23 : vector<8xf32> to vector<8x1xf32>
    %cst_17 = arith.constant 3.906250e-03 : f32
    %25 = vector.broadcast %cst_17 : f32 to vector<8x1xf32>
    %26 = arith.mulf %24, %25 : vector<8x1xf32>
    %c1_18 = arith.constant 1 : index
    %c0_19 = arith.constant 0 : index
    %c0_20 = arith.constant 0 : index
    %27 = vector.load %arg5[%c1_18, %c0_19, %c0_20] : memref<2x8x1xf32, #tpu.memory_space<vmem>>, vector<1x8x1xf32>
    %28 = vector.shape_cast %27 : vector<1x8x1xf32> to vector<8x1xf32>
    %29 = vector.shape_cast %26 : vector<8x1xf32> to vector<1x8x1xf32>
    tpu.vector_store %arg5[%c1_18, %c0_19, %c0_20], %29 {strides = array<i32>} : memref<2x8x1xf32, #tpu.memory_space<vmem>>, vector<1x8x1xf32>,
    return
  }
  func.func @transform_0(%arg0: i32, %arg1: i32) -> (i32, i32, i32) {
    %c0_i32 = arith.constant 0 : i32
    %c0_i32_0 = arith.constant 0 : i32
    return %arg0, %c0_i32, %arg1 : i32, i32, i32
  }
  func.func @transform_1(%arg0: i32, %arg1: i32) -> (i32, i32) {
    %c0_i32 = arith.constant 0 : i32
    %c0_i32_0 = arith.constant 0 : i32
    %c0_i32_1 = arith.constant 0 : i32
    return %c0_i32, %c0_i32_0 : i32, i32
  }
  func.func @transform_2(%arg0: i32, %arg1: i32) -> (i32, i32) {
    %c0_i32 = arith.constant 0 : i32
    %c0_i32_0 = arith.constant 0 : i32
    %c0_i32_1 = arith.constant 0 : i32
    return %c0_i32, %c0_i32_0 : i32, i32
  }
  func.func @transform_3(%arg0: i32, %arg1: i32) -> (i32, i32, i32) {
    %c0_i32 = arith.constant 0 : i32
    %c0_i32_0 = arith.constant 0 : i32
    %c0_i32_1 = arith.constant 0 : i32
    return %arg0, %c0_i32, %c0_i32_0 : i32, i32, i32
  }
}

</mosaic_0001>

<bundles_post_ra>
// kernel: tpu_custom_call.1
= control target key start
LH: loop header
LB: loop body
LE: loop exit
PB: predicated region body
PF: predicated region fallthrough
CT: control target
= control target key end

     0   :  { %vm28_vm0 = vcmask 1043456   ;;  %v216_v2 = vmov 0.0   ;;  %v217_v5 = vmov 0   ;;  %vm24_vm1 = vcmask 31744   ;;  %s260_s0 = inlined_call_operand.vmem [shape: f32[2,4,256], index: 0, kind: input, shape index: {}]   ;;  %s261_s1 = inlined_call_operand.vmem [shape: f32[8,4], index: 1, kind: input, shape index: {}]   ;;  %s262_s2 = inlined_call_operand.vmem [shape: f32[8,1], index: 2, kind: input, shape index: {}]   ;;  %s263_s3 = inlined_call_operand.vmem [shape: f32[2,8,1], index: 3, kind: output, shape index: {}]  }
   0x1   :  { %v16_v0 = vld [vmem:[%s260_s0] sm:$0xff]  ;;  %v206_v1 = vld [vmem:[%s260_s0 + $0x8] sm:$0xff]  ;;  %97 = vmatprep.mubr.f32.mxu0 %v216_v2  ;;  %184 = vmatprep.mubr.f32.mxu1 %v216_v2  ;;  %vm110_vm2 = vcmask 7168  }
   0x2   :  { %v23_v3 = vcombine.high %v16_v0, %v16_v0  ;;  %v115_v4 = vcombine.high %v206_v1, %v206_v1  ;;  %213 = vset.pattern.permute.xlu0 %v217_v5  ;;  %v15_v6 = vld [vmem:[%s262_s2] sm:$0xff] }
   0x3   :  { %v14_v7 = vld [vmem:[%s261_s1] sm:$0xff]  ;;  %19 = vperm.xlu0 %213, %v15_v6  }
   0x4   :  { %203 = vmatprep.subr.msk.mxu0 %vm28_vm0, %v23_v3  ;;  %207 = vmatprep.subr.msk.mxu1 %vm28_vm0, %v115_v4 }
   0x5   :  { %204 = vmatpush1.msk.msra.mxu0 %vm28_vm0, %v16_v0  ;;  %208 = vmatpush1.msk.msra.mxu1 %vm28_vm0, %v206_v1 }
   0x6   :  { %205 = vmatmul.mubr.msk.f32.vlgmr.msra.gmra.mrb[0].mxu0 %vm24_vm1, %v14_v7  ;;  %209 = vmatmul.mubr.msk.f32.vlgmr.msra.gmra.mrb[0].mxu1 %vm24_vm1, %v14_v7 }
  0x82   :  { %v20_v8 = vpop.permute.xlu0 %19 }
  0xd9   :  { %v99_v9 = vpop.f32.mrb[0].mxu0  ;;  %v186_v10 = vpop.f32.mrb[0].mxu1 }
  0xda   :  { %v100_v11 = vadd.f32 %v99_v9, %v20_v8  ;;  %v187_v12 = vadd.f32 %v186_v10, %v20_v8  ;;  %v101_v13 = vpop.f32.mrb[1].mxu0  ;;  %v188_v14 = vpop.f32.mrb[1].mxu1 }
  0xdb   :  { %v102_v15 = vadd.f32 %v101_v13, %v20_v8  ;;  %v189_v16 = vadd.f32 %v188_v14, %v20_v8 }
  0xdc   :  { %v104_v17 = vmax.f32 %v100_v11, 0.0  ;;  %v191_v18 = vmax.f32 %v187_v12, 0.0 }
  0xdd   :  { %v105_v19 = vmax.f32 %v102_v15, 0.0  ;;  %v192_v20 = vmax.f32 %v189_v16, 0.0 }
  0xdf   :  { %v193_v21 = vadd.f32 %v192_v20, %v191_v18  ;;  %v106_v22 = vadd.f32 %v105_v19, %v104_v17 }
  0xe1   :  { %194 = vadd.xlane.f32.xlu1 %v193_v21  ;;  %107 = vadd.xlane.f32.xlu0 %v106_v22 }
 0x16e   :  { %v195_v23 = vpop.xlane.xlu1 %194  ;;  %v108_v24 = vpop.xlane.xlu0 %107 }
 0x16f   :  { %v196_v25 = vmul.f32 0.00390625, %v195_v23  ;;  %v109_v26 = vmul.f32 0.00390625, %v108_v24 }
 0x171   :  { %210 = vst.msk [vmem:[%s263_s3 + $0x8] sm:$0xff] %vm110_vm2, %v196_v25  ;;  %111 = vst.msk [vmem:[%s263_s3] sm:$0xff] %vm110_vm2, %v109_v26 }

</bundles_post_ra>
